<compile_context>
chip_gen: v7x
topology: tpu7x:2x2x1
jax: 0.10.0
libtpu: 0.0.40
codegen_flags: <defaults>
</compile_context>

<pallas_src>
import functools

import jax
import jax.numpy as jnp
from jax.experimental import pallas as pl
from jax.experimental.pallas import tpu as pltpu


def _round_up(n, m):
    return ((n + m - 1) // m) * m


def _ffnn_kernel(x_ref, w_in_ref, b_in_ref, w_h_ref, b_h_ref, w_out_ref, b_out_ref,
                 o_ref, *, num_hidden_applications):
    # ---- input layer: bf16 MXU operands, f32 accumulation; bias/ReLU in f32 ----
    x = x_ref[...].astype(jnp.bfloat16)
    h = jnp.dot(x, w_in_ref[...], preferred_element_type=jnp.float32)
    h = jnp.maximum(h + b_in_ref[...], 0.0)

    # ---- shared hidden layer, applied (num_layers - 2) times ----
    # Hoist the invariant weight load AND the bias broadcast out of the loop
    # (JAX does not CSE broadcast_in_dim).
    w_h = w_h_ref[...]                                   # bf16 [depth, depth], resident
    rows, depth = h.shape[0], w_h.shape[1]
    b_h_b = jnp.broadcast_to(b_h_ref[...], (rows, depth))  # f32 [rows, depth]

    def hidden_apply(h_f32):
        hh = jnp.dot(h_f32.astype(jnp.bfloat16), w_h,
                     preferred_element_type=jnp.float32)
        return jnp.maximum(hh + b_h_b, 0.0)

    if num_hidden_applications <= 4:
        # small trip count: static unroll keeps full LLO scheduling visibility
        for _ in range(num_hidden_applications):
            h = hidden_apply(h)
    else:
        # deep reuse: real loop bounds live ranges; unroll=2 lets layer i's
        # epilogue overlap layer i+1's vmatmul pushes
        h = jax.lax.fori_loop(0, num_hidden_applications,
                              lambda i, hh: hidden_apply(hh), h,
                              unroll=2)

    # ---- output layer (no activation) ----
    out = jnp.dot(h.astype(jnp.bfloat16), w_out_ref[...],
                  preferred_element_type=jnp.float32)
    o_ref[...] = (out + b_out_ref[...]).astype(o_ref.dtype)


def ffnn_forward(x, params, *, num_layers=3, batch_tile=2048):
    """x: [B, input_size] float32. params: dict of pre-transposed weights + biases."""
    assert num_layers >= 2, "FFNN kernel assumes input + output layers (num_layers >= 2)"

    # no-op casts when init_params already stored bf16 weights / f32 biases
    w_in = params["w_in"].astype(jnp.bfloat16)    # [in, depth]
    w_h = params["w_h"].astype(jnp.bfloat16)      # [depth, depth]
    w_out = params["w_out"].astype(jnp.bfloat16)  # [depth, out]
    b_in = params["b_in"].astype(jnp.float32)     # [1, depth]
    b_h = params["b_h"].astype(jnp.float32)       # [1, depth]
    b_out = params["b_out"].astype(jnp.float32)   # [1, out]

    B, input_size = x.shape
    depth = w_in.shape[1]
    output_size = w_out.shape[1]

    # Only pad the output feature dim when it is large and merely misaligned to 128;
    # for small outputs (e.g. 8) a full-dim block is legal and avoids inflating HBM
    # writeback 16x plus the extra slice pass.
    out_pad = ((-output_size) % 128) if output_size > 128 else 0
    if out_pad:
        w_out = jnp.pad(w_out, ((0, 0), (0, out_pad)))
        b_out = jnp.pad(b_out, ((0, 0), (0, out_pad)))
    output_size_p = output_size + out_pad

    # ---- choose the batch tile ----
    batch_tile = max(256, _round_up(batch_tile, 256))
    B8 = _round_up(B, 8)                  # sublane alignment for the row-block dim
    if B8 <= batch_tile:
        if B8 >= 512:
            # large single-tile batch: split into 2 tiles so both v7x TensorCores
            # get a "parallel" grid step each (v5e/v6e: just two well-filled tiles)
            tile = _round_up(pl.cdiv(B8, 2), 256)
        else:
            tile = B8
    else:
        tile = batch_tile

    Bp = _round_up(B, tile)
    pad = Bp - B
    if pad:
        # TODO(synk): could rely on Pallas partial-block masking instead of padding,
        # pending a ragged-B validation; the pad on a 16-wide input is cheap.
        x = jnp.pad(x, ((0, pad), (0, 0)))

    kernel = functools.partial(_ffnn_kernel,
                               num_hidden_applications=num_layers - 2)

    # Grid-invariant full blocks (constant index_map => single resident DMA).
    full = lambda shape: pl.BlockSpec(shape, lambda i: (0, 0))

    out = pl.pallas_call(
        kernel,
        out_shape=jax.ShapeDtypeStruct((Bp, output_size_p), jnp.float32),
        grid_spec=pltpu.PrefetchScalarGridSpec(
            num_scalar_prefetch=0,
            grid=(Bp // tile,),
            in_specs=[
                pl.BlockSpec((tile, input_size), lambda i: (i, 0)),
                full((input_size, depth)),
                full((1, depth)),
                full((depth, depth)),
                full((1, depth)),
                full((depth, output_size_p)),
                full((1, output_size_p)),
            ],
            out_specs=pl.BlockSpec((tile, output_size_p), lambda i: (i, 0)),
        ),
        compiler_params=pltpu.CompilerParams(
            dimension_semantics=("parallel",),
            vmem_limit_bytes=32 * 1024 * 1024,
        ),
    )(x, w_in, b_in, w_h, b_h, w_out, b_out)

    if pad or out_pad:
        out = out[:B, :output_size]
    return out


def init_params(key, input_size, output_size, depth=128):
    """Deterministic init mimicking PyTorch nn.Linear (uniform +/- 1/sqrt(fan_in)).
    Weights stored pre-transposed as [in, out] and pre-cast to bf16 (MXU operands);
    biases stay f32."""
    k = jax.random.split(key, 6)

    def linear(kw, kb, fan_in, fan_out):
        bound = 1.0 / jnp.sqrt(fan_in)
        w = jax.random.uniform(kw, (fan_in, fan_out), jnp.float32, -bound, bound)
        b = jax.random.uniform(kb, (1, fan_out), jnp.float32, -bound, bound)
        return w.astype(jnp.bfloat16), b

    w_in, b_in = linear(k[0], k[1], input_size, depth)
    w_h, b_h = linear(k[2], k[3], depth, depth)
    w_out, b_out = linear(k[4], k[5], depth, output_size)
    return dict(w_in=w_in, b_in=b_in, w_h=w_h, b_h=b_h, w_out=w_out, b_out=b_out)


def _reference(x, p, num_layers=3):
    """Pure-JAX reference mirroring the kernel's math (bf16 MXU operands, f32 accum)."""
    def dot_bf16(a, w):
        return jnp.dot(a.astype(jnp.bfloat16), w.astype(jnp.bfloat16),
                       preferred_element_type=jnp.float32)

    h = jnp.maximum(dot_bf16(x, p["w_in"]) + p["b_in"], 0.0)
    for _ in range(num_layers - 2):
        h = jnp.maximum(dot_bf16(h, p["w_h"]) + p["b_h"], 0.0)
    return dot_bf16(h, p["w_out"]) + p["b_out"]


if __name__ == "__main__":
    key = jax.random.PRNGKey(0)
    input_size, output_size, depth = 16, 8, 128
    k_x, k_p = jax.random.split(key)
    params = init_params(k_p, input_size, output_size, depth)

    # Case 1: small batch (single tile, ragged -> row padding), shallow (static unroll).
    batch1, num_layers1 = 300, 3
    x1 = jax.random.normal(k_x, (batch1, input_size), jnp.float32)
    out1 = jax.block_until_ready(ffnn_forward(x1, params, num_layers=num_layers1))
    ref1 = _reference(x1, params, num_layers=num_layers1)
    assert out1.shape == (batch1, output_size)
    assert jnp.allclose(out1, ref1, atol=2e-3, rtol=2e-3), "mismatch (case 1)"

    # Case 2: larger batch (2 parallel grid steps for v7x) and deep reuse (fori_loop).
    batch2, num_layers2 = 600, 8
    x2 = jax.random.normal(k_x, (batch2, input_size), jnp.float32)
    out2 = jax.block_until_ready(ffnn_forward(x2, params, num_layers=num_layers2))
    ref2 = _reference(x2, params, num_layers=num_layers2)
    assert out2.shape == (batch2, output_size)
    assert jnp.allclose(out2, ref2, atol=5e-3, rtol=5e-3), "mismatch (case 2)"

    print("KERNEL_OK")
</pallas_src>

<mosaic_0001>
module attributes {stable_mosaic.version = 11 : i64} {
  func.func @_ffnn_kernel(%arg0: i32, %arg1: memref<304x16xf32, #tpu.memory_space<vmem>>, %arg2: memref<16x128xbf16, #tpu.memory_space<vmem>>, %arg3: memref<1x128xf32, #tpu.memory_space<vmem>>, %arg4: memref<128x128xbf16, #tpu.memory_space<vmem>>, %arg5: memref<1x128xf32, #tpu.memory_space<vmem>>, %arg6: memref<128x8xbf16, #tpu.memory_space<vmem>>, %arg7: memref<1x8xf32, #tpu.memory_space<vmem>>, %arg8: memref<304x8xf32, #tpu.memory_space<vmem>>) attributes {dimension_semantics = [#tpu.dimension_semantics<parallel>], iteration_bounds = array<i64: 1>, scalar_prefetch = 0 : i64, scratch_operands = 0 : i64, tpu.core_type = #tpu.core_type<tc>, window_params = [{transform_indices = @transform_0, window_bounds = array<i64: 304, 16>}, {pipeline_mode = #tpu.pipeline_mode<synchronous>, transform_indices = @transform_1, window_bounds = array<i64: 16, 128>}, {pipeline_mode = #tpu.pipeline_mode<synchronous>, transform_indices = @transform_2, window_bounds = array<i64: 1, 128>}, {pipeline_mode = #tpu.pipeline_mode<synchronous>, transform_indices = @transform_3, window_bounds = array<i64: 128, 128>}, {pipeline_mode = #tpu.pipeline_mode<synchronous>, transform_indices = @transform_4, window_bounds = array<i64: 1, 128>}, {pipeline_mode = #tpu.pipeline_mode<synchronous>, transform_indices = @transform_5, window_bounds = array<i64: 128, 8>}, {pipeline_mode = #tpu.pipeline_mode<synchronous>, transform_indices = @transform_6, window_bounds = array<i64: 1, 8>}, {transform_indices = @transform_7, window_bounds = array<i64: 304, 8>}]} {
    %c0 = arith.constant 0 : index
    %c0_0 = arith.constant 0 : index
    %0 = vector.load %arg1[%c0, %c0_0] : memref<304x16xf32, #tpu.memory_space<vmem>>, vector<304x16xf32>
    %1 = arith.truncf %0 : vector<304x16xf32> to vector<304x16xbf16>
    %c0_1 = arith.constant 0 : index
    %c0_2 = arith.constant 0 : index
    %2 = vector.load %arg2[%c0_1, %c0_2] : memref<16x128xbf16, #tpu.memory_space<vmem>>, vector<16x128xbf16>
    %cst = arith.constant dense<0.000000e+00> : vector<304x128xf32>
    %3 = tpu.matmul %1, %2, %cst {dimension_numbers = #tpu.dot_dimension_numbers<[1], [0], [0], [1], [0, 0, 1, 1], [], []>} : vector<304x16xbf16>, vector<16x128xbf16>, vector<304x128xf32> -> vector<304x128xf32>
    %c0_3 = arith.constant 0 : index
    %c0_4 = arith.constant 0 : index
    %4 = vector.load %arg3[%c0_3, %c0_4] : memref<1x128xf32, #tpu.memory_space<vmem>>, vector<1x128xf32>
    %5 = vector.broadcast %4 : vector<1x128xf32> to vector<304x128xf32>
    %6 = arith.addf %3, %5 : vector<304x128xf32>
    %cst_5 = arith.constant 0.000000e+00 : f32
    %7 = vector.broadcast %cst_5 : f32 to vector<304x128xf32>
    %8 = arith.maximumf %6, %7 : vector<304x128xf32>
    %c0_6 = arith.constant 0 : index
    %c0_7 = arith.constant 0 : index
    %9 = vector.load %arg4[%c0_6, %c0_7] : memref<128x128xbf16, #tpu.memory_space<vmem>>, vector<128x128xbf16>
    %c0_8 = arith.constant 0 : index
    %c0_9 = arith.constant 0 : index
    %10 = vector.load %arg5[%c0_8, %c0_9] : memref<1x128xf32, #tpu.memory_space<vmem>>, vector<1x128xf32>
    %11 = vector.shape_cast %10 : vector<1x128xf32> to vector<1x128xf32>
    %12 = vector.broadcast %11 : vector<1x128xf32> to vector<304x128xf32>
    %13 = arith.truncf %8 : vector<304x128xf32> to vector<304x128xbf16>
    %cst_10 = arith.constant dense<0.000000e+00> : vector<304x128xf32>
    %14 = tpu.matmul %13, %9, %cst_10 {dimension_numbers = #tpu.dot_dimension_numbers<[1], [0], [0], [1], [0, 0, 1, 1], [], []>} : vector<304x128xbf16>, vector<128x128xbf16>, vector<304x128xf32> -> vector<304x128xf32>
    %15 = arith.addf %14, %12 : vector<304x128xf32>
    %cst_11 = arith.constant 0.000000e+00 : f32
    %16 = vector.broadcast %cst_11 : f32 to vector<304x128xf32>
    %17 = arith.maximumf %15, %16 : vector<304x128xf32>
    %18 = arith.truncf %17 : vector<304x128xf32> to vector<304x128xbf16>
    %c0_12 = arith.constant 0 : index
    %c0_13 = arith.constant 0 : index
    %19 = vector.load %arg6[%c0_12, %c0_13] : memref<128x8xbf16, #tpu.memory_space<vmem>>, vector<128x8xbf16>
    %cst_14 = arith.constant dense<0.000000e+00> : vector<304x8xf32>
    %20 = tpu.matmul %18, %19, %cst_14 {dimension_numbers = #tpu.dot_dimension_numbers<[1], [0], [0], [1], [0, 0, 1, 1], [], []>} : vector<304x128xbf16>, vector<128x8xbf16>, vector<304x8xf32> -> vector<304x8xf32>
    %c0_15 = arith.constant 0 : index
    %c0_16 = arith.constant 0 : index
    %21 = vector.load %arg7[%c0_15, %c0_16] : memref<1x8xf32, #tpu.memory_space<vmem>>, vector<1x8xf32>
    %22 = vector.broadcast %21 : vector<1x8xf32> to vector<304x8xf32>
    %23 = arith.addf %20, %22 : vector<304x8xf32>
    %c0_17 = arith.constant 0 : index
    %c0_18 = arith.constant 0 : index
    %24 = vector.load %arg8[%c0_17, %c0_18] : memref<304x8xf32, #tpu.memory_space<vmem>>, vector<304x8xf32>
    tpu.vector_store %arg8[%c0_17, %c0_18], %23 {strides = array<i32>} : memref<304x8xf32, #tpu.memory_space<vmem>>, vector<304x8xf32>,
    return
  }
  func.func @transform_0(%arg0: i32) -> (i32, i32) {
    %c0_i32 = arith.constant 0 : i32
    %c0_i32_0 = arith.constant 0 : i32
    return %arg0, %c0_i32 : i32, i32
  }
  func.func @transform_1(%arg0: i32) -> (i32, i32) {
    %c0_i32 = arith.constant 0 : i32
    %c0_i32_0 = arith.constant 0 : i32
    %c0_i32_1 = arith.constant 0 : i32
    return %c0_i32, %c0_i32_0 : i32, i32
  }
  func.func @transform_2(%arg0: i32) -> (i32, i32) {
    %c0_i32 = arith.constant 0 : i32
    %c0_i32_0 = arith.constant 0 : i32
    %c0_i32_1 = arith.constant 0 : i32
    return %c0_i32, %c0_i32_0 : i32, i32
  }
  func.func @transform_3(%arg0: i32) -> (i32, i32) {
    %c0_i32 = arith.constant 0 : i32
    %c0_i32_0 = arith.constant 0 : i32
    %c0_i32_1 = arith.constant 0 : i32
    return %c0_i32, %c0_i32_0 : i32, i32
  }
  func.func @transform_4(%arg0: i32) -> (i32, i32) {
    %c0_i32 = arith.constant 0 : i32
    %c0_i32_0 = arith.constant 0 : i32
    %c0_i32_1 = arith.constant 0 : i32
    return %c0_i32, %c0_i32_0 : i32, i32
  }
  func.func @transform_5(%arg0: i32) -> (i32, i32) {
    %c0_i32 = arith.constant 0 : i32
    %c0_i32_0 = arith.constant 0 : i32
    %c0_i32_1 = arith.constant 0 : i32
    return %c0_i32, %c0_i32_0 : i32, i32
  }
  func.func @transform_6(%arg0: i32) -> (i32, i32) {
    %c0_i32 = arith.constant 0 : i32
    %c0_i32_0 = arith.constant 0 : i32
    %c0_i32_1 = arith.constant 0 : i32
    return %c0_i32, %c0_i32_0 : i32, i32
  }
  func.func @transform_7(%arg0: i32) -> (i32, i32) {
    %c0_i32 = arith.constant 0 : i32
    %c0_i32_0 = arith.constant 0 : i32
    return %arg0, %c0_i32 : i32, i32
  }
}

</mosaic_0001>

<bundles_post_ra>
// kernel: tpu_custom_call.1
= control target key start
LH: loop header
LB: loop body
LE: loop exit
PB: predicated region body
PF: predicated region fallthrough
CT: control target
= control target key end

     0   :  { %v1407_v0 = vmov 0.0   ;;  %vm1408_vm0 = vmmov 0   ;;  %vm99_vm1 = vcmask 130048   ;;  %vm968_vm2 = vcmask 64512   ;;  %s2064_s1 = inlined_call_operand.vmem [shape: bf16[16,128], index: 1, kind: input, shape index: {}]   ;;  %s2065_s0 = inlined_call_operand.vmem [shape: f32[304,16], index: 0, kind: input, shape index: {}]   ;;  %s2066_s3 = inlined_call_operand.vmem [shape: bf16[128,128], index: 3, kind: input, shape index: {}]   ;;  %s2067_s2 = inlined_call_operand.vmem [shape: f32[1,128], index: 2, kind: input, shape index: {}]   ;;  %s2068_s5 = inlined_call_operand.vmem [shape: bf16[128,8], index: 5, kind: input, shape index: {}]   ;;  %s2069_s4 = inlined_call_operand.vmem [shape: f32[1,128], index: 4, kind: input, shape index: {}]   ;;  %s2070_s6 = inlined_call_operand.vmem [shape: f32[1,8], index: 6, kind: input, shape index: {}]   ;;  %s2071_s7 = inlined_call_operand.vmem [shape: f32[304,8], index: 7, kind: output, shape index: {}]  }
   0x1   :  { %1124 = vmatprep.subr.bf16.mxu0 %v1407_v0  ;;  %v1390_v1 = vld [vmem:[%s2064_s1] sm:$0xff]   ;;  %1126 = vmatprep.mubr.msk.bf16.mxu0 %vm1408_vm0, %v1407_v0  ;;  %v28_v3 = vld [vmem:[%s2065_s0 + $0x8] sm:$0xff]  ;;  %v29_v5 = vld [vmem:[%s2065_s0 + $0x10] sm:$0xff] }
   0x2   :  { %v27_v2 = vld [vmem:[%s2065_s0] sm:$0xff]  ;;  %1386 = vmatprep.subr.bf16.mxu1 %v1407_v0  ;;  %1166 = vmatprep.mubr.msk.bf16.mxu1 %vm1408_vm0, %v1407_v0  ;;  %v30_v6 = vld [vmem:[%s2065_s0 + $0x18] sm:$0xff]  ;;  %v48_v8 = vld [vmem:[%s2065_s0 + $0xa8] sm:$0xff] }
   0x3   :  { %1125 = vmatpush3.bf16.msra.mxu0 %v1390_v1  ;;  %v65_v4 = vpack.c.bf16 %v28_v3, %v27_v2  ;;  %1387 = vmatpush3.bf16.msra.mxu1 %v1390_v1  ;;  %v47_v7 = vld [vmem:[%s2065_s0 + $0xa0] sm:$0xff]  ;;  %v66_v9 = vpack.c.bf16 %v30_v6, %v29_v5  ;;  %v49_v11 = vld [vmem:[%s2065_s0 + $0xb0] sm:$0xff]  ;;  %v50_v12 = vld [vmem:[%s2065_s0 + $0xb8] sm:$0xff] }
   0x4   :  { %1202 = vmatprep.subr.bf16.mxu1 %v1407_v0  ;;  %1294 = vmatprep.subr.bf16.mxu0 %v1407_v0  ;;  %v75_v10 = vpack.c.bf16 %v48_v8, %v47_v7  ;;  %v31_v13 = vld [vmem:[%s2065_s0 + $0x20] sm:$0xff]  ;;  %v32_v14 = vld [vmem:[%s2065_s0 + $0x28] sm:$0xff]  ;;  %v76_v16 = vpack.c.bf16 %v50_v12, %v49_v11  ;;  %v1393_v21 = vld [vmem:[%s2066_s3 + $0x10] sm:$0xff]  }
   0x5   :  { %v1391_v15 = vld [vmem:[%s2066_s3] sm:$0xff]   ;;  %v1392_v17 = vld [vmem:[%s2066_s3 + $0x8] sm:$0xff]   ;;  %v67_v18 = vpack.c.bf16 %v32_v14, %v31_v13  ;;  %v33_v22 = vld [vmem:[%s2065_s0 + $0x30] sm:$0xff] }
   0x6   :  { %1127 = vmatmul.mubr.msk.bf16.vlgmr.msra.gmra.mrb[0].mxu0 %vm99_vm1, %v65_v4  ;;  %1167 = vmatmul.mubr.msk.bf16.vlgmr.msra.gmra.mrb[0].mxu1 %vm99_vm1, %v75_v10  ;;  %v51_v19 = vld [vmem:[%s2065_s0 + $0xc0] sm:$0xff]  ;;  %v52_v20 = vld [vmem:[%s2065_s0 + $0xc8] sm:$0xff]  ;;  %v34_v23 = vld [vmem:[%s2065_s0 + $0x38] sm:$0xff] }
   0x7   :  { %1130 = vmatprep.mubr.msk.bf16.mxu0 %vm1408_vm0, %v1407_v0  ;;  %1170 = vmatprep.mubr.msk.bf16.mxu1 %vm1408_vm0, %v1407_v0  ;;  %v77_v24 = vpack.c.bf16 %v52_v20, %v51_v19  ;;  %v1394_v25 = vld [vmem:[%s2066_s3 + $0x18] sm:$0xff]   ;;  %v68_v26 = vpack.c.bf16 %v34_v23, %v33_v22  ;;  %v53_v27 = vld [vmem:[%s2065_s0 + $0xd0] sm:$0xff]  ;;  %v1395_v29 = vld [vmem:[%s2066_s3 + $0x20] sm:$0xff]  }
   0x8   :  { %1203 = vmatpush3.bf16.msra.mxu1 %v1391_v15  ;;  %v54_v28 = vld [vmem:[%s2065_s0 + $0xd8] sm:$0xff]  ;;  %v35_v30 = vld [vmem:[%s2065_s0 + $0x40] sm:$0xff]  ;;  %v36_v31 = vld [vmem:[%s2065_s0 + $0x48] sm:$0xff] }
   0x9   :  { %1204 = vmatprep.subr.bf16.mxu1 %v1407_v0  ;;  %v78_v32 = vpack.c.bf16 %v54_v28, %v53_v27  ;;  %v1396_v33 = vld [vmem:[%s2066_s3 + $0x28] sm:$0xff]   ;;  %v69_v34 = vpack.c.bf16 %v36_v31, %v35_v30  ;;  %v55_v35 = vld [vmem:[%s2065_s0 + $0xe0] sm:$0xff]  ;;  %v1397_v37 = vld [vmem:[%s2066_s3 + $0x30] sm:$0xff]  }
   0xa   :  { %v56_v36 = vld [vmem:[%s2065_s0 + $0xe8] sm:$0xff]  ;;  %v37_v38 = vld [vmem:[%s2065_s0 + $0x50] sm:$0xff]  ;;  %v38_v39 = vld [vmem:[%s2065_s0 + $0x58] sm:$0xff] }
   0xb   :  { %v79_v40 = vpack.c.bf16 %v56_v36, %v55_v35  ;;  %v70_v41 = vpack.c.bf16 %v38_v39, %v37_v38  ;;  %v57_v42 = vld [vmem:[%s2065_s0 + $0xf0] sm:$0xff]  ;;  %v58_v43 = vld [vmem:[%s2065_s0 + $0xf8] sm:$0xff]  ;;  %v39_v44 = vld [vmem:[%s2065_s0 + $0x60] sm:$0xff] }
   0xc   :  { %1205 = vmatpush3.bf16.msra.mxu1 %v1392_v17  ;;  %v40_v45 = vld [vmem:[%s2065_s0 + $0x68] sm:$0xff]  ;;  %v80_v46 = vpack.c.bf16 %v58_v43, %v57_v42  ;;  %v59_v48 = vld [vmem:[%s2065_s0 + $0x100] sm:$0xff]  ;;  %v41_v50 = vld [vmem:[%s2065_s0 + $0x70] sm:$0xff] }
   0xd   :  { %1206 = vmatprep.subr.bf16.mxu1 %v1407_v0  ;;  %v71_v47 = vpack.c.bf16 %v40_v45, %v39_v44  ;;  %v60_v49 = vld [vmem:[%s2065_s0 + $0x108] sm:$0xff]  ;;  %v42_v51 = vld [vmem:[%s2065_s0 + $0x78] sm:$0xff]  ;;  %v61_v54 = vld [vmem:[%s2065_s0 + $0x110] sm:$0xff] }
   0xe   :  { %1131 = vmatmul.mubr.msk.bf16.gmra.mrb[4].mxu0 %vm99_vm1, %v66_v9  ;;  %1171 = vmatmul.mubr.msk.bf16.gmra.mrb[4].mxu1 %vm99_vm1, %v76_v16  ;;  %v81_v52 = vpack.c.bf16 %v60_v49, %v59_v48  ;;  %v72_v53 = vpack.c.bf16 %v42_v51, %v41_v50  ;;  %v62_v55 = vld [vmem:[%s2065_s0 + $0x118] sm:$0xff]  ;;  %v43_v56 = vld [vmem:[%s2065_s0 + $0x80] sm:$0xff]  ;;  %v44_v57 = vld [vmem:[%s2065_s0 + $0x88] sm:$0xff] }
   0xf   :  { %1134 = vmatprep.mubr.msk.bf16.mxu0 %vm1408_vm0, %v1407_v0  ;;  %1174 = vmatprep.mubr.msk.bf16.mxu1 %vm1408_vm0, %v1407_v0  ;;  %v82_v58 = vpack.c.bf16 %v62_v55, %v61_v54  ;;  %v73_v59 = vpack.c.bf16 %v44_v57, %v43_v56  ;;  %v63_v60 = vld [vmem:[%s2065_s0 + $0x120] sm:$0xff]  ;;  %v64_v61 = vld [vmem:[%s2065_s0 + $0x128] sm:$0xff]  ;;  %v45_v62 = vld [vmem:[%s2065_s0 + $0x90] sm:$0xff] }
  0x10   :  { %1207 = vmatpush3.bf16.msra.mxu1 %v1393_v21  ;;  %v46_v63 = vld [vmem:[%s2065_s0 + $0x98] sm:$0xff]  ;;  %v83_v1 = vpack.c.bf16 %v64_v61, %v63_v60  ;;  %v1665_v4 = vld [vmem:[%s2067_s2] ss:$0 sm:$0xff]  ;;  %v1400_v61 = vld [vmem:[%s2068_s5 + $0x8] sm:$0xff]  }
  0x11   :  { %1208 = vmatprep.subr.bf16.mxu1 %v1407_v0  ;;  %v74_v2 = vpack.c.bf16 %v46_v63, %v45_v62  ;;  %v1398_v3 = vld [vmem:[%s2066_s3 + $0x38] sm:$0xff]   ;;  %v1399_v43 = vld [vmem:[%s2068_s5] sm:$0xff]  }
  0x12   :  { %1295 = vmatpush3.bf16.msra.mxu0 %v1399_v43 }
  0x13   :  { %1296 = vmatprep.subr.bf16.mxu0 %v1407_v0 }
  0x14   :  { %1209 = vmatpush3.bf16.msra.mxu1 %v1394_v25 }
  0x15   :  { %1210 = vmatprep.subr.bf16.mxu1 %v1407_v0 }
  0x16   :  { %1135 = vmatmul.mubr.msk.bf16.gmra.mrb[8].mxu0 %vm99_vm1, %v67_v18  ;;  %1175 = vmatmul.mubr.msk.bf16.gmra.mrb[8].mxu1 %vm99_vm1, %v77_v24 }
  0x17   :  { %1138 = vmatprep.mubr.msk.bf16.mxu0 %vm1408_vm0, %v1407_v0  ;;  %1178 = vmatprep.mubr.msk.bf16.mxu1 %vm1408_vm0, %v1407_v0 }
  0x18   :  { %1211 = vmatpush3.bf16.msra.mxu1 %v1395_v29  ;;  %1297 = vmatpush3.bf16.msra.mxu0 %v1400_v61 }
  0x19   :  { %1212 = vmatprep.subr.bf16.mxu1 %v1407_v0  ;;  %1298 = vmatprep.subr.bf16.mxu0 %v1407_v0 }
  0x1c   :  { %1213 = vmatpush3.bf16.msra.mxu1 %v1396_v33 }
  0x1d   :  { %1214 = vmatprep.subr.bf16.mxu1 %v1407_v0 }
  0x1e   :  { %1139 = vmatmul.mubr.msk.bf16.gmra.mrb[12].mxu0 %vm99_vm1, %v68_v26  ;;  %1179 = vmatmul.mubr.msk.bf16.gmra.mrb[12].mxu1 %vm99_vm1, %v78_v32 }
  0x1f   :  { %1142 = vmatprep.mubr.msk.bf16.mxu0 %vm1408_vm0, %v1407_v0  ;;  %1182 = vmatprep.mubr.msk.bf16.mxu1 %vm1408_vm0, %v1407_v0 }
  0x20   :  { %1215 = vmatpush3.bf16.msra.mxu1 %v1397_v37 }
  0x21   :  { %1216 = vmatprep.subr.bf16.mxu1 %v1407_v0 }
  0x24   :  { %1217 = vmatpush3.bf16.msra.mxu1 %v1398_v3  ;;  %v1401_v3 = vld [vmem:[%s2068_s5 + $0x10] sm:$0xff]  }
  0x25   :  { %1299 = vmatpush3.bf16.msra.mxu0 %v1401_v3 }
  0x26   :  { %1143 = vmatmul.mubr.msk.bf16.gmra.mrb[16].mxu0 %vm99_vm1, %v69_v34  ;;  %1183 = vmatmul.mubr.msk.bf16.gmra.mrb[16].mxu1 %vm99_vm1, %v79_v40 }
  0x27   :  { %1146 = vmatprep.mubr.msk.bf16.mxu0 %vm1408_vm0, %v1407_v0  ;;  %1186 = vmatprep.mubr.msk.bf16.mxu1 %vm1408_vm0, %v1407_v0 }
  0x28   :  { %1300 = vmatprep.subr.bf16.mxu0 %v1407_v0 }
  0x2e   :  { %1147 = vmatmul.mubr.msk.bf16.gmra.mrb[20].mxu0 %vm99_vm1, %v70_v41  ;;  %1187 = vmatmul.mubr.msk.bf16.gmra.mrb[20].mxu1 %vm99_vm1, %v80_v46 }
  0x2f   :  { %1150 = vmatprep.mubr.msk.bf16.mxu0 %vm1408_vm0, %v1407_v0  ;;  %1190 = vmatprep.mubr.msk.bf16.mxu1 %vm1408_vm0, %v1407_v0 }
  0x36   :  { %1151 = vmatmul.mubr.msk.bf16.gmra.mrb[24].mxu0 %vm99_vm1, %v71_v47  ;;  %1191 = vmatmul.mubr.msk.bf16.gmra.mrb[24].mxu1 %vm99_vm1, %v81_v52 }
  0x37   :  { %1154 = vmatprep.mubr.msk.bf16.mxu0 %vm1408_vm0, %v1407_v0  ;;  %1194 = vmatprep.mubr.msk.bf16.mxu1 %vm1408_vm0, %v1407_v0 }
  0x3e   :  { %1155 = vmatmul.mubr.msk.bf16.gmra.mrb[28].mxu0 %vm99_vm1, %v72_v53  ;;  %1195 = vmatmul.mubr.msk.bf16.gmra.mrb[28].mxu1 %vm99_vm1, %v82_v58 }
  0x3f   :  { %1158 = vmatprep.mubr.msk.bf16.mxu0 %vm1408_vm0, %v1407_v0  ;;  %1198 = vmatprep.mubr.msk.bf16.mxu1 %vm1408_vm0, %v1407_v0 }
  0x46   :  { %1159 = vmatmul.mubr.msk.bf16.gmra.mrb[32].mxu0 %vm99_vm1, %v73_v59  ;;  %1199 = vmatmul.mubr.msk.bf16.gmra.mrb[32].mxu1 %vm99_vm1, %v83_v1 }
  0x47   :  { %1162 = vmatprep.mubr.msk.bf16.mxu0 %vm1408_vm0, %v1407_v0  ;;  %1218 = vmatprep.mubr.msk.bf16.mxu1 %vm1408_vm0, %v1407_v0 }
  0x4e   :  { %1163 = vmatmul.mubr.msk.bf16.gmra.mrb[36].mxu0 %vm99_vm1, %v74_v2 }
  0x4f   :  { %1310 = vmatprep.mubr.msk.bf16.mxu0 %vm1408_vm0, %v1407_v0 }
  0xd9   :  { %v191_v5 = vpop.f32.mrb[0].mxu0  ;;  %v271_v13 = vpop.f32.mrb[0].mxu1 }
  0xda   :  { %v192_v6 = vadd.f32 %v1665_v4, %v191_v5  ;;  %v1128_v7 = vpop.f32.mrb[1].mxu0  ;;  %v272_v15 = vadd.f32 %v1665_v4, %v271_v13  ;;  %v1168_v16 = vpop.f32.mrb[1].mxu1 }
  0xdb   :  { %v194_v8 = vpop.f32.mrb[2].mxu0  ;;  %v274_v18 = vpop.f32.mrb[2].mxu1 }
  0xdc   :  { %v195_v9 = vadd.f32 %v1665_v4, %v194_v8  ;;  %v1129_v10 = vpop.f32.mrb[3].mxu0  ;;  %v342_v11 = vmax.f32 %v192_v6, 0.0  ;;  %v362_v21 = vmax.f32 %v272_v15, 0.0  ;;  %v275_v22 = vadd.f32 %v1665_v4, %v274_v18  ;;  %v1169_v23 = vpop.f32.mrb[3].mxu1 }
  0xde   :  { %v343_v12 = vmax.f32 %v195_v9, 0.0  ;;  %v363_v27 = vmax.f32 %v275_v22, 0.0 }
  0xe0   :  { %v403_v14 = vpack.c.bf16 %v343_v12, %v342_v11  ;;  %v1675_v30 = vpack.c.bf16 %v363_v27, %v362_v21  ;;  %v1402_v12 = vld [vmem:[%s2068_s5 + $0x18] sm:$0xff]  }
  0xe1   :  { %v199_v17 = vpop.f32.mrb[4].mxu0  ;;  %v279_v31 = vpop.f32.mrb[4].mxu1  ;;  %1301 = vmatpush3.bf16.msra.mxu0 %v1402_v12 }
  0xe2   :  { %v200_v19 = vadd.f32 %v1665_v4, %v199_v17  ;;  %v1132_v20 = vpop.f32.mrb[5].mxu0  ;;  %1219 = vmatmul.mubr.bf16.vlgmr.msra.gmra.mrb[36].mxu1 %v403_v14  ;;  %v280_v33 = vadd.f32 %v1665_v4, %v279_v31  ;;  %v1172_v34 = vpop.f32.mrb[5].mxu1  ;;  %1302 = vmatprep.subr.bf16.mxu0 %v1407_v0 }
  0xe3   :  { %v202_v24 = vpop.f32.mrb[6].mxu0  ;;  %1222 = vmatprep.mubr.msk.bf16.mxu1 %vm1408_vm0, %v1407_v0  ;;  %v282_v36 = vpop.f32.mrb[6].mxu1 }
  0xe4   :  { %v203_v25 = vadd.f32 %v1665_v4, %v202_v24  ;;  %v1133_v26 = vpop.f32.mrb[7].mxu0  ;;  %v344_v28 = vmax.f32 %v200_v19, 0.0  ;;  %v364_v39 = vmax.f32 %v280_v33, 0.0  ;;  %v283_v40 = vadd.f32 %v1665_v4, %v282_v36  ;;  %v1173_v41 = vpop.f32.mrb[7].mxu1  ;;  %v1403_v24 = vld [vmem:[%s2068_s5 + $0x20] sm:$0xff]   ;;  %v1404_v33 = vld [vmem:[%s2068_s5 + $0x28] sm:$0xff]  }
  0xe5   :  { %1303 = vmatpush3.bf16.msra.mxu0 %v1403_v24 }
  0xe6   :  { %v345_v29 = vmax.f32 %v203_v25, 0.0  ;;  %v365_v46 = vmax.f32 %v283_v40, 0.0  ;;  %1304 = vmatprep.subr.bf16.mxu0 %v1407_v0 }
  0xe8   :  { %v404_v32 = vpack.c.bf16 %v345_v29, %v344_v28  ;;  %v1686_v49 = vpack.c.bf16 %v365_v46, %v364_v39 }
  0xe9   :  { %v207_v35 = vpop.f32.mrb[8].mxu0  ;;  %v287_v50 = vpop.f32.mrb[8].mxu1  ;;  %1305 = vmatpush3.bf16.msra.mxu0 %v1404_v33 }
  0xea   :  { %v208_v37 = vadd.f32 %v1665_v4, %v207_v35  ;;  %v1136_v38 = vpop.f32.mrb[9].mxu0  ;;  %1223 = vmatmul.mubr.bf16.gmra.mrb[40].mxu1 %v404_v32  ;;  %v288_v52 = vadd.f32 %v1665_v4, %v287_v50  ;;  %v1176_v53 = vpop.f32.mrb[9].mxu1  ;;  %1306 = vmatprep.subr.bf16.mxu0 %v1407_v0 }
  0xeb   :  { %v210_v42 = vpop.f32.mrb[10].mxu0  ;;  %1226 = vmatprep.mubr.msk.bf16.mxu1 %vm1408_vm0, %v1407_v0  ;;  %v290_v55 = vpop.f32.mrb[10].mxu1 }
  0xec   :  { %v211_v44 = vadd.f32 %v1665_v4, %v210_v42  ;;  %v1137_v45 = vpop.f32.mrb[11].mxu0  ;;  %v346_v47 = vmax.f32 %v208_v37, 0.0  ;;  %v366_v58 = vmax.f32 %v288_v52, 0.0  ;;  %v291_v59 = vadd.f32 %v1665_v4, %v290_v55  ;;  %v1177_v60 = vpop.f32.mrb[11].mxu1 }
  0xed   :  { %v1405_v45 = vld [vmem:[%s2068_s5 + $0x30] sm:$0xff]  }
  0xee   :  { %v347_v48 = vmax.f32 %v211_v44, 0.0  ;;  %v367_v2 = vmax.f32 %v291_v59, 0.0  ;;  %1307 = vmatpush3.bf16.msra.mxu0 %v1405_v45 }
  0xef   :  { %1308 = vmatprep.subr.bf16.mxu0 %v1407_v0 }
  0xf0   :  { %v405_v51 = vpack.c.bf16 %v347_v48, %v346_v47  ;;  %v1702_v7 = vpack.c.bf16 %v367_v2, %v366_v58 }
  0xf1   :  { %v215_v54 = vpop.f32.mrb[12].mxu0  ;;  %v295_v8 = vpop.f32.mrb[12].mxu1 }
  0xf2   :  { %v216_v56 = vadd.f32 %v1665_v4, %v215_v54  ;;  %v1140_v57 = vpop.f32.mrb[13].mxu0  ;;  %1227 = vmatmul.mubr.bf16.gmra.mrb[44].mxu1 %v405_v51  ;;  %v296_v10 = vadd.f32 %v1665_v4, %v295_v8  ;;  %v1180_v11 = vpop.f32.mrb[13].mxu1  ;;  %v1406_v54 = vld [vmem:[%s2068_s5 + $0x38] sm:$0xff]  }
  0xf3   :  { %v218_v62 = vpop.f32.mrb[14].mxu0  ;;  %1230 = vmatprep.mubr.msk.bf16.mxu1 %vm1408_vm0, %v1407_v0  ;;  %v298_v14 = vpop.f32.mrb[14].mxu1  ;;  %1309 = vmatpush3.bf16.msra.mxu0 %v1406_v54 }
  0xf4   :  { %v219_v63 = vadd.f32 %v1665_v4, %v218_v62  ;;  %v1141_v1 = vpop.f32.mrb[15].mxu0  ;;  %v348_v5 = vmax.f32 %v216_v56, 0.0  ;;  %v368_v17 = vmax.f32 %v296_v10, 0.0  ;;  %v299_v18 = vadd.f32 %v1665_v4, %v298_v14  ;;  %v1181_v19 = vpop.f32.mrb[15].mxu1 }
  0xf6   :  { %v349_v6 = vmax.f32 %v219_v63, 0.0  ;;  %v369_v23 = vmax.f32 %v299_v18, 0.0 }
  0xf8   :  { %v406_v9 = vpack.c.bf16 %v349_v6, %v348_v5  ;;  %v1718_v27 = vpack.c.bf16 %v369_v23, %v368_v17 }
  0xf9   :  { %v223_v13 = vpop.f32.mrb[16].mxu0  ;;  %v303_v28 = vpop.f32.mrb[16].mxu1 }
  0xfa   :  { %v224_v15 = vadd.f32 %v1665_v4, %v223_v13  ;;  %v1144_v16 = vpop.f32.mrb[17].mxu0  ;;  %1231 = vmatmul.mubr.bf16.gmra.mrb[48].mxu1 %v406_v9  ;;  %v304_v31 = vadd.f32 %v1665_v4, %v303_v28  ;;  %v1184_v32 = vpop.f32.mrb[17].mxu1 }
  0xfb   :  { %v226_v20 = vpop.f32.mrb[18].mxu0  ;;  %1234 = vmatprep.mubr.msk.bf16.mxu1 %vm1408_vm0, %v1407_v0  ;;  %v306_v35 = vpop.f32.mrb[18].mxu1 }
  0xfc   :  { %v227_v21 = vadd.f32 %v1665_v4, %v226_v20  ;;  %v1145_v22 = vpop.f32.mrb[19].mxu0  ;;  %v350_v25 = vmax.f32 %v224_v15, 0.0  ;;  %v370_v38 = vmax.f32 %v304_v31, 0.0  ;;  %v307_v39 = vadd.f32 %v1665_v4, %v306_v35  ;;  %v1185_v40 = vpop.f32.mrb[19].mxu1 }
  0xfe   :  { %v351_v26 = vmax.f32 %v227_v21, 0.0  ;;  %v371_v44 = vmax.f32 %v307_v39, 0.0 }
 0x100   :  { %v407_v29 = vpack.c.bf16 %v351_v26, %v350_v25  ;;  %v1734_v48 = vpack.c.bf16 %v371_v44, %v370_v38 }
 0x101   :  { %v231_v34 = vpop.f32.mrb[20].mxu0  ;;  %v311_v50 = vpop.f32.mrb[20].mxu1 }
 0x102   :  { %v232_v36 = vadd.f32 %v1665_v4, %v231_v34  ;;  %v1148_v37 = vpop.f32.mrb[21].mxu0  ;;  %1235 = vmatmul.mubr.bf16.gmra.mrb[52].mxu1 %v407_v29  ;;  %v312_v52 = vadd.f32 %v1665_v4, %v311_v50  ;;  %v1188_v53 = vpop.f32.mrb[21].mxu1 }
 0x103   :  { %v234_v41 = vpop.f32.mrb[22].mxu0  ;;  %1238 = vmatprep.mubr.msk.bf16.mxu1 %vm1408_vm0, %v1407_v0  ;;  %v314_v56 = vpop.f32.mrb[22].mxu1 }
 0x104   :  { %v235_v42 = vadd.f32 %v1665_v4, %v234_v41  ;;  %v1149_v43 = vpop.f32.mrb[23].mxu0  ;;  %v352_v46 = vmax.f32 %v232_v36, 0.0  ;;  %v372_v59 = vmax.f32 %v312_v52, 0.0  ;;  %v315_v60 = vadd.f32 %v1665_v4, %v314_v56  ;;  %v1189_v61 = vpop.f32.mrb[23].mxu1 }
 0x106   :  { %v353_v47 = vmax.f32 %v235_v42, 0.0  ;;  %v373_v2 = vmax.f32 %v315_v60, 0.0 }
 0x108   :  { %v408_v51 = vpack.c.bf16 %v353_v47, %v352_v46  ;;  %v1746_v6 = vpack.c.bf16 %v373_v2, %v372_v59 }
 0x109   :  { %v239_v55 = vpop.f32.mrb[24].mxu0  ;;  %v319_v8 = vpop.f32.mrb[24].mxu1 }
 0x10a   :  { %v240_v57 = vadd.f32 %v1665_v4, %v239_v55  ;;  %v1152_v58 = vpop.f32.mrb[25].mxu0  ;;  %1239 = vmatmul.mubr.bf16.gmra.mrb[56].mxu1 %v408_v51  ;;  %v320_v10 = vadd.f32 %v1665_v4, %v319_v8  ;;  %v1192_v11 = vpop.f32.mrb[25].mxu1 }
 0x10b   :  { %v242_v62 = vpop.f32.mrb[26].mxu0  ;;  %1242 = vmatprep.mubr.msk.bf16.mxu1 %vm1408_vm0, %v1407_v0  ;;  %v322_v13 = vpop.f32.mrb[26].mxu1 }
 0x10c   :  { %v243_v63 = vadd.f32 %v1665_v4, %v242_v62  ;;  %v1153_v1 = vpop.f32.mrb[27].mxu0  ;;  %v354_v3 = vmax.f32 %v240_v57, 0.0  ;;  %v374_v16 = vmax.f32 %v320_v10, 0.0  ;;  %v323_v17 = vadd.f32 %v1665_v4, %v322_v13  ;;  %v1193_v18 = vpop.f32.mrb[27].mxu1 }
 0x10e   :  { %v355_v5 = vmax.f32 %v243_v63, 0.0  ;;  %v375_v22 = vmax.f32 %v323_v17, 0.0 }
 0x110   :  { %v409_v9 = vpack.c.bf16 %v355_v5, %v354_v3  ;;  %v419_v25 = vpack.c.bf16 %v375_v22, %v374_v16 }
 0x111   :  { %v247_v12 = vpop.f32.mrb[28].mxu0  ;;  %v327_v26 = vpop.f32.mrb[28].mxu1 }
 0x112   :  { %v248_v14 = vadd.f32 %v1665_v4, %v247_v12  ;;  %v1156_v15 = vpop.f32.mrb[29].mxu0  ;;  %1243 = vmatmul.mubr.bf16.gmra.mrb[60].mxu1 %v409_v9  ;;  %v328_v29 = vadd.f32 %v1665_v4, %v327_v26  ;;  %v1196_v31 = vpop.f32.mrb[29].mxu1 }
 0x113   :  { %v250_v19 = vpop.f32.mrb[30].mxu0  ;;  %1246 = vmatprep.mubr.msk.bf16.mxu1 %vm1408_vm0, %v1407_v0  ;;  %v330_v33 = vpop.f32.mrb[30].mxu1 }
 0x114   :  { %v251_v20 = vadd.f32 %v1665_v4, %v250_v19  ;;  %v1157_v21 = vpop.f32.mrb[31].mxu0  ;;  %v356_v23 = vmax.f32 %v248_v14, 0.0  ;;  %v376_v36 = vmax.f32 %v328_v29, 0.0  ;;  %v331_v37 = vadd.f32 %v1665_v4, %v330_v33  ;;  %v1197_v38 = vpop.f32.mrb[31].mxu1 }
 0x116   :  { %v357_v24 = vmax.f32 %v251_v20, 0.0  ;;  %v377_v42 = vmax.f32 %v331_v37, 0.0 }
 0x118   :  { %v410_v28 = vpack.c.bf16 %v357_v24, %v356_v23  ;;  %v420_v45 = vpack.c.bf16 %v377_v42, %v376_v36 }
 0x119   :  { %v255_v32 = vpop.f32.mrb[32].mxu0  ;;  %v335_v46 = vpop.f32.mrb[32].mxu1 }
 0x11a   :  { %v256_v34 = vadd.f32 %v1665_v4, %v255_v32  ;;  %v1160_v35 = vpop.f32.mrb[33].mxu0  ;;  %1247 = vmatmul.mubr.bf16.gmra.mrb[64].mxu1 %v410_v28  ;;  %v336_v50 = vadd.f32 %v1665_v4, %v335_v46  ;;  %v1200_v51 = vpop.f32.mrb[33].mxu1 }
 0x11b   :  { %v258_v39 = vpop.f32.mrb[34].mxu0  ;;  %1250 = vmatprep.mubr.msk.bf16.mxu1 %vm1408_vm0, %v1407_v0  ;;  %v338_v53 = vpop.f32.mrb[34].mxu1 }
 0x11c   :  { %v259_v40 = vadd.f32 %v1665_v4, %v258_v39  ;;  %v1161_v41 = vpop.f32.mrb[35].mxu0  ;;  %v358_v43 = vmax.f32 %v256_v34, 0.0  ;;  %v378_v56 = vmax.f32 %v336_v50, 0.0  ;;  %v339_v57 = vadd.f32 %v1665_v4, %v338_v53  ;;  %v1201_v58 = vpop.f32.mrb[35].mxu1 }
 0x11e   :  { %v359_v44 = vmax.f32 %v259_v40, 0.0  ;;  %v379_v62 = vmax.f32 %v339_v57, 0.0 }
 0x120   :  { %v411_v47 = vpack.c.bf16 %v359_v44, %v358_v43  ;;  %v421_v2 = vpack.c.bf16 %v379_v62, %v378_v56 }
 0x121   :  { %v263_v52 = vpop.f32.mrb[36].mxu0 }
 0x122   :  { %v264_v54 = vadd.f32 %v1665_v4, %v263_v52  ;;  %v1164_v55 = vpop.f32.mrb[37].mxu0  ;;  %1251 = vmatmul.mubr.bf16.gmra.mrb[68].mxu1 %v411_v47 }
 0x123   :  { %v266_v59 = vpop.f32.mrb[38].mxu0  ;;  %1254 = vmatprep.mubr.msk.bf16.mxu1 %vm1408_vm0, %v1407_v0 }
 0x124   :  { %v267_v60 = vadd.f32 %v1665_v4, %v266_v59  ;;  %v1165_v61 = vpop.f32.mrb[39].mxu0  ;;  %v360_v63 = vmax.f32 %v264_v54, 0.0  ;;  %v1793_v4 = vld [vmem:[%s2069_s4] ss:$0 sm:$0xff] }
 0x126   :  { %v361_v1 = vmax.f32 %v267_v60, 0.0 }
 0x128   :  { %v412_v3 = vpack.c.bf16 %v361_v1, %v360_v63 }
 0x12a   :  { %1255 = vmatmul.mubr.bf16.gmra.mrb[72].mxu1 %v412_v3 }
 0x12b   :  { %1258 = vmatprep.mubr.msk.bf16.mxu1 %vm1408_vm0, %v1407_v0 }
 0x132   :  { %1259 = vmatmul.mubr.bf16.gmra.mrb[76].mxu1 %v1675_v30 }
 0x133   :  { %1262 = vmatprep.mubr.msk.bf16.mxu1 %vm1408_vm0, %v1407_v0 }
 0x13a   :  { %1263 = vmatmul.mubr.bf16.gmra.mrb[80].mxu1 %v1686_v49 }
 0x13b   :  { %1266 = vmatprep.mubr.msk.bf16.mxu1 %vm1408_vm0, %v1407_v0 }
 0x142   :  { %1267 = vmatmul.mubr.bf16.gmra.mrb[84].mxu1 %v1702_v7 }
 0x143   :  { %1270 = vmatprep.mubr.msk.bf16.mxu1 %vm1408_vm0, %v1407_v0 }
 0x14a   :  { %1271 = vmatmul.mubr.bf16.gmra.mrb[88].mxu1 %v1718_v27 }
 0x14b   :  { %1274 = vmatprep.mubr.msk.bf16.mxu1 %vm1408_vm0, %v1407_v0 }
 0x152   :  { %1275 = vmatmul.mubr.bf16.gmra.mrb[92].mxu1 %v1734_v48 }
 0x153   :  { %1278 = vmatprep.mubr.msk.bf16.mxu1 %vm1408_vm0, %v1407_v0 }
 0x15a   :  { %1279 = vmatmul.mubr.bf16.gmra.mrb[96].mxu1 %v1746_v6 }
 0x15b   :  { %1282 = vmatprep.mubr.msk.bf16.mxu1 %vm1408_vm0, %v1407_v0 }
 0x162   :  { %1283 = vmatmul.mubr.bf16.gmra.mrb[100].mxu1 %v419_v25 }
 0x163   :  { %1286 = vmatprep.mubr.msk.bf16.mxu1 %vm1408_vm0, %v1407_v0 }
 0x16a   :  { %1287 = vmatmul.mubr.bf16.gmra.mrb[104].mxu1 %v420_v45 }
 0x16b   :  { %1290 = vmatprep.mubr.msk.bf16.mxu1 %vm1408_vm0, %v1407_v0 }
 0x172   :  { %1291 = vmatmul.mubr.bf16.gmra.mrb[108].mxu1 %v421_v2 }
 0x1b5   :  { %v504_v30 = vpop.f32.mrb[36].mxu1 }
 0x1b6   :  { %v505_v49 = vadd.f32 %v1793_v4, %v504_v30  ;;  %v1220_v7 = vpop.f32.mrb[37].mxu1 }
 0x1b7   :  { %v507_v27 = vpop.f32.mrb[38].mxu1 }
 0x1b8   :  { %v508_v48 = vadd.f32 %v1793_v4, %v507_v27  ;;  %v1221_v5 = vpop.f32.mrb[39].mxu1  ;;  %v655_v6 = vmax.f32 %v505_v49, 0.0 }
 0x1ba   :  { %v656_v8 = vmax.f32 %v508_v48, 0.0 }
 0x1bc   :  { %v693_v9 = vpack.c.bf16 %v656_v8, %v655_v6 }
 0x1bd   :  { %v512_v10 = vpop.f32.mrb[40].mxu1 }
 0x1be   :  { %v513_v11 = vadd.f32 %v1793_v4, %v512_v10  ;;  %v1224_v12 = vpop.f32.mrb[41].mxu1  ;;  %1311 = vmatmul.mubr.bf16.vlgmr.msra.gmra.mrb[40].mxu0 %v693_v9 }
 0x1bf   :  { %v515_v13 = vpop.f32.mrb[42].mxu1  ;;  %1314 = vmatprep.mubr.msk.bf16.mxu0 %vm1408_vm0, %v1407_v0 }
 0x1c0   :  { %v516_v14 = vadd.f32 %v1793_v4, %v515_v13  ;;  %v1225_v15 = vpop.f32.mrb[43].mxu1  ;;  %v657_v16 = vmax.f32 %v513_v11, 0.0 }
 0x1c2   :  { %v658_v17 = vmax.f32 %v516_v14, 0.0 }
 0x1c4   :  { %v694_v18 = vpack.c.bf16 %v658_v17, %v657_v16 }
 0x1c5   :  { %v520_v19 = vpop.f32.mrb[44].mxu1 }
 0x1c6   :  { %v521_v20 = vadd.f32 %v1793_v4, %v520_v19  ;;  %v1228_v21 = vpop.f32.mrb[45].mxu1  ;;  %1315 = vmatmul.mubr.bf16.gmra.mrb[44].mxu0 %v694_v18 }
 0x1c7   :  { %v523_v22 = vpop.f32.mrb[46].mxu1  ;;  %1318 = vmatprep.mubr.msk.bf16.mxu0 %vm1408_vm0, %v1407_v0 }
 0x1c8   :  { %v524_v23 = vadd.f32 %v1793_v4, %v523_v22  ;;  %v1229_v24 = vpop.f32.mrb[47].mxu1  ;;  %v659_v25 = vmax.f32 %v521_v20, 0.0 }
 0x1ca   :  { %v660_v26 = vmax.f32 %v524_v23, 0.0 }
 0x1cc   :  { %v695_v28 = vpack.c.bf16 %v660_v26, %v659_v25 }
 0x1cd   :  { %v528_v29 = vpop.f32.mrb[48].mxu1 }
 0x1ce   :  { %v529_v31 = vadd.f32 %v1793_v4, %v528_v29  ;;  %v1232_v32 = vpop.f32.mrb[49].mxu1  ;;  %1319 = vmatmul.mubr.bf16.gmra.mrb[48].mxu0 %v695_v28 }
 0x1cf   :  { %v531_v33 = vpop.f32.mrb[50].mxu1  ;;  %1322 = vmatprep.mubr.msk.bf16.mxu0 %vm1408_vm0, %v1407_v0 }
 0x1d0   :  { %v532_v34 = vadd.f32 %v1793_v4, %v531_v33  ;;  %v1233_v35 = vpop.f32.mrb[51].mxu1  ;;  %v661_v36 = vmax.f32 %v529_v31, 0.0 }
 0x1d2   :  { %v662_v37 = vmax.f32 %v532_v34, 0.0 }
 0x1d4   :  { %v696_v38 = vpack.c.bf16 %v662_v37, %v661_v36 }
 0x1d5   :  { %v536_v39 = vpop.f32.mrb[52].mxu1 }
 0x1d6   :  { %v537_v40 = vadd.f32 %v1793_v4, %v536_v39  ;;  %v1236_v41 = vpop.f32.mrb[53].mxu1  ;;  %1323 = vmatmul.mubr.bf16.gmra.mrb[52].mxu0 %v696_v38 }
 0x1d7   :  { %v539_v42 = vpop.f32.mrb[54].mxu1  ;;  %1326 = vmatprep.mubr.msk.bf16.mxu0 %vm1408_vm0, %v1407_v0 }
 0x1d8   :  { %v540_v43 = vadd.f32 %v1793_v4, %v539_v42  ;;  %v1237_v44 = vpop.f32.mrb[55].mxu1  ;;  %v663_v45 = vmax.f32 %v537_v40, 0.0 }
 0x1da   :  { %v664_v46 = vmax.f32 %v540_v43, 0.0 }
 0x1dc   :  { %v697_v47 = vpack.c.bf16 %v664_v46, %v663_v45 }
 0x1dd   :  { %v544_v50 = vpop.f32.mrb[56].mxu1 }
 0x1de   :  { %v545_v51 = vadd.f32 %v1793_v4, %v544_v50  ;;  %v1240_v52 = vpop.f32.mrb[57].mxu1  ;;  %1327 = vmatmul.mubr.bf16.gmra.mrb[56].mxu0 %v697_v47 }
 0x1df   :  { %v547_v53 = vpop.f32.mrb[58].mxu1  ;;  %1330 = vmatprep.mubr.msk.bf16.mxu0 %vm1408_vm0, %v1407_v0 }
 0x1e0   :  { %v548_v54 = vadd.f32 %v1793_v4, %v547_v53  ;;  %v1241_v55 = vpop.f32.mrb[59].mxu1  ;;  %v665_v56 = vmax.f32 %v545_v51, 0.0 }
 0x1e2   :  { %v666_v57 = vmax.f32 %v548_v54, 0.0 }
 0x1e4   :  { %v698_v58 = vpack.c.bf16 %v666_v57, %v665_v56 }
 0x1e5   :  { %v552_v59 = vpop.f32.mrb[60].mxu1 }
 0x1e6   :  { %v553_v60 = vadd.f32 %v1793_v4, %v552_v59  ;;  %v1244_v61 = vpop.f32.mrb[61].mxu1  ;;  %1331 = vmatmul.mubr.bf16.gmra.mrb[60].mxu0 %v698_v58 }
 0x1e7   :  { %v555_v62 = vpop.f32.mrb[62].mxu1  ;;  %1334 = vmatprep.mubr.msk.bf16.mxu0 %vm1408_vm0, %v1407_v0 }
 0x1e8   :  { %v556_v63 = vadd.f32 %v1793_v4, %v555_v62  ;;  %v1245_v1 = vpop.f32.mrb[63].mxu1  ;;  %v667_v2 = vmax.f32 %v553_v60, 0.0 }
 0x1ea   :  { %v668_v3 = vmax.f32 %v556_v63, 0.0 }
 0x1ec   :  { %v699_v30 = vpack.c.bf16 %v668_v3, %v667_v2 }
 0x1ed   :  { %v560_v49 = vpop.f32.mrb[64].mxu1 }
 0x1ee   :  { %v561_v7 = vadd.f32 %v1793_v4, %v560_v49  ;;  %v1248_v27 = vpop.f32.mrb[65].mxu1  ;;  %1335 = vmatmul.mubr.bf16.gmra.mrb[64].mxu0 %v699_v30 }
 0x1ef   :  { %v563_v48 = vpop.f32.mrb[66].mxu1  ;;  %1338 = vmatprep.mubr.msk.bf16.mxu0 %vm1408_vm0, %v1407_v0 }
 0x1f0   :  { %v564_v5 = vadd.f32 %v1793_v4, %v563_v48  ;;  %v1249_v6 = vpop.f32.mrb[67].mxu1  ;;  %v669_v8 = vmax.f32 %v561_v7, 0.0 }
 0x1f2   :  { %v670_v9 = vmax.f32 %v564_v5, 0.0 }
 0x1f4   :  { %v700_v10 = vpack.c.bf16 %v670_v9, %v669_v8 }
 0x1f5   :  { %v568_v11 = vpop.f32.mrb[68].mxu1 }
 0x1f6   :  { %v569_v12 = vadd.f32 %v1793_v4, %v568_v11  ;;  %v1252_v13 = vpop.f32.mrb[69].mxu1  ;;  %1339 = vmatmul.mubr.bf16.gmra.mrb[68].mxu0 %v700_v10 }
 0x1f7   :  { %v571_v14 = vpop.f32.mrb[70].mxu1  ;;  %1342 = vmatprep.mubr.msk.bf16.mxu0 %vm1408_vm0, %v1407_v0 }
 0x1f8   :  { %v572_v15 = vadd.f32 %v1793_v4, %v571_v14  ;;  %v1253_v16 = vpop.f32.mrb[71].mxu1  ;;  %v671_v17 = vmax.f32 %v569_v12, 0.0 }
 0x1fa   :  { %v672_v18 = vmax.f32 %v572_v15, 0.0 }
 0x1fc   :  { %v701_v19 = vpack.c.bf16 %v672_v18, %v671_v17 }
 0x1fd   :  { %v576_v20 = vpop.f32.mrb[72].mxu1 }
 0x1fe   :  { %v577_v21 = vadd.f32 %v1793_v4, %v576_v20  ;;  %v1256_v22 = vpop.f32.mrb[73].mxu1  ;;  %1343 = vmatmul.mubr.bf16.gmra.mrb[72].mxu0 %v701_v19 }
 0x1ff   :  { %v579_v23 = vpop.f32.mrb[74].mxu1  ;;  %1346 = vmatprep.mubr.msk.bf16.mxu0 %vm1408_vm0, %v1407_v0 }
 0x200   :  { %v580_v24 = vadd.f32 %v1793_v4, %v579_v23  ;;  %v1257_v25 = vpop.f32.mrb[75].mxu1  ;;  %v673_v26 = vmax.f32 %v577_v21, 0.0 }
 0x202   :  { %v674_v28 = vmax.f32 %v580_v24, 0.0 }
 0x204   :  { %v702_v29 = vpack.c.bf16 %v674_v28, %v673_v26 }
 0x205   :  { %v584_v31 = vpop.f32.mrb[76].mxu1 }
 0x206   :  { %v585_v32 = vadd.f32 %v1793_v4, %v584_v31  ;;  %v1260_v33 = vpop.f32.mrb[77].mxu1  ;;  %1347 = vmatmul.mubr.bf16.gmra.mrb[76].mxu0 %v702_v29 }
 0x207   :  { %v587_v34 = vpop.f32.mrb[78].mxu1  ;;  %1350 = vmatprep.mubr.msk.bf16.mxu0 %vm1408_vm0, %v1407_v0 }
 0x208   :  { %v588_v35 = vadd.f32 %v1793_v4, %v587_v34  ;;  %v1261_v36 = vpop.f32.mrb[79].mxu1  ;;  %v675_v37 = vmax.f32 %v585_v32, 0.0 }
 0x20a   :  { %v676_v38 = vmax.f32 %v588_v35, 0.0 }
 0x20c   :  { %v703_v39 = vpack.c.bf16 %v676_v38, %v675_v37 }
 0x20d   :  { %v592_v40 = vpop.f32.mrb[80].mxu1 }
 0x20e   :  { %v593_v41 = vadd.f32 %v1793_v4, %v592_v40  ;;  %v1264_v42 = vpop.f32.mrb[81].mxu1  ;;  %1351 = vmatmul.mubr.bf16.gmra.mrb[80].mxu0 %v703_v39 }
 0x20f   :  { %v595_v43 = vpop.f32.mrb[82].mxu1  ;;  %1354 = vmatprep.mubr.msk.bf16.mxu0 %vm1408_vm0, %v1407_v0 }
 0x210   :  { %v596_v44 = vadd.f32 %v1793_v4, %v595_v43  ;;  %v1265_v45 = vpop.f32.mrb[83].mxu1  ;;  %v677_v46 = vmax.f32 %v593_v41, 0.0 }
 0x212   :  { %v678_v47 = vmax.f32 %v596_v44, 0.0 }
 0x214   :  { %v704_v50 = vpack.c.bf16 %v678_v47, %v677_v46 }
 0x215   :  { %v600_v51 = vpop.f32.mrb[84].mxu1 }
 0x216   :  { %v601_v52 = vadd.f32 %v1793_v4, %v600_v51  ;;  %v1268_v53 = vpop.f32.mrb[85].mxu1  ;;  %1355 = vmatmul.mubr.bf16.gmra.mrb[84].mxu0 %v704_v50 }
 0x217   :  { %v603_v54 = vpop.f32.mrb[86].mxu1  ;;  %1358 = vmatprep.mubr.msk.bf16.mxu0 %vm1408_vm0, %v1407_v0 }
 0x218   :  { %v604_v55 = vadd.f32 %v1793_v4, %v603_v54  ;;  %v1269_v56 = vpop.f32.mrb[87].mxu1  ;;  %v679_v57 = vmax.f32 %v601_v52, 0.0  ;;  %v1872_v52 = vld [vmem:[%s2070_s6] ss:$0 sm:$0xff] }
 0x21a   :  { %v680_v58 = vmax.f32 %v604_v55, 0.0 }
 0x21c   :  { %v705_v59 = vpack.c.bf16 %v680_v58, %v679_v57 }
 0x21d   :  { %v608_v60 = vpop.f32.mrb[88].mxu1 }
 0x21e   :  { %v609_v61 = vadd.f32 %v1793_v4, %v608_v60  ;;  %v1272_v62 = vpop.f32.mrb[89].mxu1  ;;  %1359 = vmatmul.mubr.bf16.gmra.mrb[88].mxu0 %v705_v59 }
 0x21f   :  { %v611_v63 = vpop.f32.mrb[90].mxu1  ;;  %1362 = vmatprep.mubr.msk.bf16.mxu0 %vm1408_vm0, %v1407_v0 }
 0x220   :  { %v612_v1 = vadd.f32 %v1793_v4, %v611_v63  ;;  %v1273_v2 = vpop.f32.mrb[91].mxu1  ;;  %v681_v3 = vmax.f32 %v609_v61, 0.0 }
 0x222   :  { %v682_v30 = vmax.f32 %v612_v1, 0.0 }
 0x224   :  { %v706_v49 = vpack.c.bf16 %v682_v30, %v681_v3 }
 0x225   :  { %v616_v7 = vpop.f32.mrb[92].mxu1 }
 0x226   :  { %v617_v27 = vadd.f32 %v1793_v4, %v616_v7  ;;  %v1276_v48 = vpop.f32.mrb[93].mxu1  ;;  %1363 = vmatmul.mubr.bf16.gmra.mrb[92].mxu0 %v706_v49 }
 0x227   :  { %v619_v5 = vpop.f32.mrb[94].mxu1  ;;  %1366 = vmatprep.mubr.msk.bf16.mxu0 %vm1408_vm0, %v1407_v0 }
 0x228   :  { %v620_v6 = vadd.f32 %v1793_v4, %v619_v5  ;;  %v1277_v8 = vpop.f32.mrb[95].mxu1  ;;  %v683_v9 = vmax.f32 %v617_v27, 0.0 }
 0x22a   :  { %v684_v10 = vmax.f32 %v620_v6, 0.0 }
 0x22c   :  { %v707_v11 = vpack.c.bf16 %v684_v10, %v683_v9 }
 0x22d   :  { %v624_v12 = vpop.f32.mrb[96].mxu1 }
 0x22e   :  { %v625_v13 = vadd.f32 %v1793_v4, %v624_v12  ;;  %v1280_v14 = vpop.f32.mrb[97].mxu1  ;;  %1367 = vmatmul.mubr.bf16.gmra.mrb[96].mxu0 %v707_v11 }
 0x22f   :  { %v627_v15 = vpop.f32.mrb[98].mxu1  ;;  %1370 = vmatprep.mubr.msk.bf16.mxu0 %vm1408_vm0, %v1407_v0 }
 0x230   :  { %v628_v16 = vadd.f32 %v1793_v4, %v627_v15  ;;  %v1281_v17 = vpop.f32.mrb[99].mxu1  ;;  %v685_v18 = vmax.f32 %v625_v13, 0.0 }
 0x232   :  { %v686_v19 = vmax.f32 %v628_v16, 0.0 }
 0x234   :  { %v708_v20 = vpack.c.bf16 %v686_v19, %v685_v18 }
 0x235   :  { %v632_v21 = vpop.f32.mrb[100].mxu1 }
 0x236   :  { %v633_v22 = vadd.f32 %v1793_v4, %v632_v21  ;;  %v1284_v23 = vpop.f32.mrb[101].mxu1  ;;  %1371 = vmatmul.mubr.bf16.gmra.mrb[100].mxu0 %v708_v20 }
 0x237   :  { %v635_v24 = vpop.f32.mrb[102].mxu1  ;;  %1374 = vmatprep.mubr.msk.bf16.mxu0 %vm1408_vm0, %v1407_v0 }
 0x238   :  { %v636_v25 = vadd.f32 %v1793_v4, %v635_v24  ;;  %v1285_v26 = vpop.f32.mrb[103].mxu1  ;;  %v687_v28 = vmax.f32 %v633_v22, 0.0 }
 0x23a   :  { %v688_v29 = vmax.f32 %v636_v25, 0.0 }
 0x23c   :  { %v709_v31 = vpack.c.bf16 %v688_v29, %v687_v28 }
 0x23d   :  { %v640_v32 = vpop.f32.mrb[104].mxu1 }
 0x23e   :  { %v641_v33 = vadd.f32 %v1793_v4, %v640_v32  ;;  %v1288_v34 = vpop.f32.mrb[105].mxu1  ;;  %1375 = vmatmul.mubr.bf16.gmra.mrb[104].mxu0 %v709_v31 }
 0x23f   :  { %v643_v35 = vpop.f32.mrb[106].mxu1  ;;  %1378 = vmatprep.mubr.msk.bf16.mxu0 %vm1408_vm0, %v1407_v0 }
 0x240   :  { %v644_v36 = vadd.f32 %v1793_v4, %v643_v35  ;;  %v1289_v37 = vpop.f32.mrb[107].mxu1  ;;  %v689_v38 = vmax.f32 %v641_v33, 0.0 }
 0x242   :  { %v690_v39 = vmax.f32 %v644_v36, 0.0 }
 0x244   :  { %v710_v40 = vpack.c.bf16 %v690_v39, %v689_v38 }
 0x245   :  { %v648_v41 = vpop.f32.mrb[108].mxu1 }
 0x246   :  { %v649_v42 = vadd.f32 %v1793_v4, %v648_v41  ;;  %v1292_v43 = vpop.f32.mrb[109].mxu1  ;;  %1379 = vmatmul.mubr.bf16.gmra.mrb[108].mxu0 %v710_v40 }
 0x247   :  { %v651_v44 = vpop.f32.mrb[110].mxu1  ;;  %1382 = vmatprep.mubr.msk.bf16.mxu0 %vm1408_vm0, %v1407_v0 }
 0x248   :  { %v652_v45 = vadd.f32 %v1793_v4, %v651_v44  ;;  %v1293_v46 = vpop.f32.mrb[111].mxu1  ;;  %v691_v47 = vmax.f32 %v649_v42, 0.0 }
 0x24a   :  { %v692_v50 = vmax.f32 %v652_v45, 0.0 }
 0x24c   :  { %v711_v51 = vpack.c.bf16 %v692_v50, %v691_v47 }
 0x24e   :  { %1383 = vmatmul.mubr.bf16.gmra.mrb[112].mxu0 %v711_v51 }
 0x291   :  { %v817_v53 = vpop.f32.mrb[40].mxu0 }
 0x292   :  { %v818_v54 = vadd.f32 %v1872_v52, %v817_v53  ;;  %v1312_v55 = vpop.f32.mrb[41].mxu0 }
 0x293   :  { %v820_v56 = vpop.f32.mrb[42].mxu0 }
 0x294   :  { %969 = vst.msk [vmem:[%s2071_s7] sm:$0xff] %vm968_vm2, %v818_v54  ;;  %v821_v0 = vadd.f32 %v1872_v52, %v820_v56  ;;  %v1313_v4 = vpop.f32.mrb[43].mxu0 }
 0x296   :  { %970 = vst.msk [vmem:[%s2071_s7 + $0x8] sm:$0xff] %vm968_vm2, %v821_v0 }
 0x299   :  { %v825_v57 = vpop.f32.mrb[44].mxu0 }
 0x29a   :  { %v826_v58 = vadd.f32 %v1872_v52, %v825_v57  ;;  %v1316_v59 = vpop.f32.mrb[45].mxu0 }
 0x29b   :  { %v828_v60 = vpop.f32.mrb[46].mxu0 }
 0x29c   :  { %971 = vst.msk [vmem:[%s2071_s7 + $0x10] sm:$0xff] %vm968_vm2, %v826_v58  ;;  %v829_v61 = vadd.f32 %v1872_v52, %v828_v60  ;;  %v1317_v62 = vpop.f32.mrb[47].mxu0 }
 0x29e   :  { %972 = vst.msk [vmem:[%s2071_s7 + $0x18] sm:$0xff] %vm968_vm2, %v829_v61 }
 0x2a1   :  { %v833_v63 = vpop.f32.mrb[48].mxu0 }
 0x2a2   :  { %v834_v1 = vadd.f32 %v1872_v52, %v833_v63  ;;  %v1320_v2 = vpop.f32.mrb[49].mxu0 }
 0x2a3   :  { %v836_v3 = vpop.f32.mrb[50].mxu0 }
 0x2a4   :  { %973 = vst.msk [vmem:[%s2071_s7 + $0x20] sm:$0xff] %vm968_vm2, %v834_v1  ;;  %v837_v30 = vadd.f32 %v1872_v52, %v836_v3  ;;  %v1321_v49 = vpop.f32.mrb[51].mxu0 }
 0x2a6   :  { %974 = vst.msk [vmem:[%s2071_s7 + $0x28] sm:$0xff] %vm968_vm2, %v837_v30 }
 0x2a9   :  { %v841_v7 = vpop.f32.mrb[52].mxu0 }
 0x2aa   :  { %v842_v27 = vadd.f32 %v1872_v52, %v841_v7  ;;  %v1324_v48 = vpop.f32.mrb[53].mxu0 }
 0x2ab   :  { %v844_v5 = vpop.f32.mrb[54].mxu0 }
 0x2ac   :  { %975 = vst.msk [vmem:[%s2071_s7 + $0x30] sm:$0xff] %vm968_vm2, %v842_v27  ;;  %v845_v6 = vadd.f32 %v1872_v52, %v844_v5  ;;  %v1325_v8 = vpop.f32.mrb[55].mxu0 }
 0x2ae   :  { %976 = vst.msk [vmem:[%s2071_s7 + $0x38] sm:$0xff] %vm968_vm2, %v845_v6 }
 0x2b1   :  { %v849_v9 = vpop.f32.mrb[56].mxu0 }
 0x2b2   :  { %v850_v10 = vadd.f32 %v1872_v52, %v849_v9  ;;  %v1328_v11 = vpop.f32.mrb[57].mxu0 }
 0x2b3   :  { %v852_v12 = vpop.f32.mrb[58].mxu0 }
 0x2b4   :  { %977 = vst.msk [vmem:[%s2071_s7 + $0x40] sm:$0xff] %vm968_vm2, %v850_v10  ;;  %v853_v13 = vadd.f32 %v1872_v52, %v852_v12  ;;  %v1329_v14 = vpop.f32.mrb[59].mxu0 }
 0x2b6   :  { %978 = vst.msk [vmem:[%s2071_s7 + $0x48] sm:$0xff] %vm968_vm2, %v853_v13 }
 0x2b9   :  { %v857_v15 = vpop.f32.mrb[60].mxu0 }
 0x2ba   :  { %v858_v16 = vadd.f32 %v1872_v52, %v857_v15  ;;  %v1332_v17 = vpop.f32.mrb[61].mxu0 }
 0x2bb   :  { %v860_v18 = vpop.f32.mrb[62].mxu0 }
 0x2bc   :  { %979 = vst.msk [vmem:[%s2071_s7 + $0x50] sm:$0xff] %vm968_vm2, %v858_v16  ;;  %v861_v19 = vadd.f32 %v1872_v52, %v860_v18  ;;  %v1333_v20 = vpop.f32.mrb[63].mxu0 }
 0x2be   :  { %980 = vst.msk [vmem:[%s2071_s7 + $0x58] sm:$0xff] %vm968_vm2, %v861_v19 }
 0x2c1   :  { %v865_v21 = vpop.f32.mrb[64].mxu0 }
 0x2c2   :  { %v866_v22 = vadd.f32 %v1872_v52, %v865_v21  ;;  %v1336_v23 = vpop.f32.mrb[65].mxu0 }
 0x2c3   :  { %v868_v24 = vpop.f32.mrb[66].mxu0 }
 0x2c4   :  { %981 = vst.msk [vmem:[%s2071_s7 + $0x60] sm:$0xff] %vm968_vm2, %v866_v22  ;;  %v869_v25 = vadd.f32 %v1872_v52, %v868_v24  ;;  %v1337_v26 = vpop.f32.mrb[67].mxu0 }
 0x2c6   :  { %982 = vst.msk [vmem:[%s2071_s7 + $0x68] sm:$0xff] %vm968_vm2, %v869_v25 }
 0x2c9   :  { %v873_v28 = vpop.f32.mrb[68].mxu0 }
 0x2ca   :  { %v874_v29 = vadd.f32 %v1872_v52, %v873_v28  ;;  %v1340_v31 = vpop.f32.mrb[69].mxu0 }
 0x2cb   :  { %v876_v32 = vpop.f32.mrb[70].mxu0 }
 0x2cc   :  { %983 = vst.msk [vmem:[%s2071_s7 + $0x70] sm:$0xff] %vm968_vm2, %v874_v29  ;;  %v877_v33 = vadd.f32 %v1872_v52, %v876_v32  ;;  %v1341_v34 = vpop.f32.mrb[71].mxu0 }
 0x2ce   :  { %984 = vst.msk [vmem:[%s2071_s7 + $0x78] sm:$0xff] %vm968_vm2, %v877_v33 }
 0x2d1   :  { %v881_v35 = vpop.f32.mrb[72].mxu0 }
 0x2d2   :  { %v882_v36 = vadd.f32 %v1872_v52, %v881_v35  ;;  %v1344_v37 = vpop.f32.mrb[73].mxu0 }
 0x2d3   :  { %v884_v38 = vpop.f32.mrb[74].mxu0 }
 0x2d4   :  { %985 = vst.msk [vmem:[%s2071_s7 + $0x80] sm:$0xff] %vm968_vm2, %v882_v36  ;;  %v885_v39 = vadd.f32 %v1872_v52, %v884_v38  ;;  %v1345_v40 = vpop.f32.mrb[75].mxu0 }
 0x2d6   :  { %986 = vst.msk [vmem:[%s2071_s7 + $0x88] sm:$0xff] %vm968_vm2, %v885_v39 }
 0x2d9   :  { %v889_v41 = vpop.f32.mrb[76].mxu0 }
 0x2da   :  { %v890_v42 = vadd.f32 %v1872_v52, %v889_v41  ;;  %v1348_v43 = vpop.f32.mrb[77].mxu0 }
 0x2db   :  { %v892_v44 = vpop.f32.mrb[78].mxu0 }
 0x2dc   :  { %987 = vst.msk [vmem:[%s2071_s7 + $0x90] sm:$0xff] %vm968_vm2, %v890_v42  ;;  %v893_v45 = vadd.f32 %v1872_v52, %v892_v44  ;;  %v1349_v46 = vpop.f32.mrb[79].mxu0 }
 0x2de   :  { %988 = vst.msk [vmem:[%s2071_s7 + $0x98] sm:$0xff] %vm968_vm2, %v893_v45 }
 0x2e1   :  { %v897_v47 = vpop.f32.mrb[80].mxu0 }
 0x2e2   :  { %v898_v50 = vadd.f32 %v1872_v52, %v897_v47  ;;  %v1352_v51 = vpop.f32.mrb[81].mxu0 }
 0x2e3   :  { %v900_v53 = vpop.f32.mrb[82].mxu0 }
 0x2e4   :  { %989 = vst.msk [vmem:[%s2071_s7 + $0xa0] sm:$0xff] %vm968_vm2, %v898_v50  ;;  %v901_v54 = vadd.f32 %v1872_v52, %v900_v53  ;;  %v1353_v55 = vpop.f32.mrb[83].mxu0 }
 0x2e6   :  { %990 = vst.msk [vmem:[%s2071_s7 + $0xa8] sm:$0xff] %vm968_vm2, %v901_v54 }
 0x2e9   :  { %v905_v56 = vpop.f32.mrb[84].mxu0 }
 0x2ea   :  { %v906_v0 = vadd.f32 %v1872_v52, %v905_v56  ;;  %v1356_v4 = vpop.f32.mrb[85].mxu0 }
 0x2eb   :  { %v908_v57 = vpop.f32.mrb[86].mxu0 }
 0x2ec   :  { %991 = vst.msk [vmem:[%s2071_s7 + $0xb0] sm:$0xff] %vm968_vm2, %v906_v0  ;;  %v909_v58 = vadd.f32 %v1872_v52, %v908_v57  ;;  %v1357_v59 = vpop.f32.mrb[87].mxu0 }
 0x2ee   :  { %992 = vst.msk [vmem:[%s2071_s7 + $0xb8] sm:$0xff] %vm968_vm2, %v909_v58 }
 0x2f1   :  { %v913_v60 = vpop.f32.mrb[88].mxu0 }
 0x2f2   :  { %v914_v61 = vadd.f32 %v1872_v52, %v913_v60  ;;  %v1360_v62 = vpop.f32.mrb[89].mxu0 }
 0x2f3   :  { %v916_v63 = vpop.f32.mrb[90].mxu0 }
 0x2f4   :  { %993 = vst.msk [vmem:[%s2071_s7 + $0xc0] sm:$0xff] %vm968_vm2, %v914_v61  ;;  %v917_v1 = vadd.f32 %v1872_v52, %v916_v63  ;;  %v1361_v2 = vpop.f32.mrb[91].mxu0 }
 0x2f6   :  { %994 = vst.msk [vmem:[%s2071_s7 + $0xc8] sm:$0xff] %vm968_vm2, %v917_v1 }
 0x2f9   :  { %v921_v3 = vpop.f32.mrb[92].mxu0 }
 0x2fa   :  { %v922_v30 = vadd.f32 %v1872_v52, %v921_v3  ;;  %v1364_v49 = vpop.f32.mrb[93].mxu0 }
 0x2fb   :  { %v924_v7 = vpop.f32.mrb[94].mxu0 }
 0x2fc   :  { %995 = vst.msk [vmem:[%s2071_s7 + $0xd0] sm:$0xff] %vm968_vm2, %v922_v30  ;;  %v925_v27 = vadd.f32 %v1872_v52, %v924_v7  ;;  %v1365_v48 = vpop.f32.mrb[95].mxu0 }
 0x2fe   :  { %996 = vst.msk [vmem:[%s2071_s7 + $0xd8] sm:$0xff] %vm968_vm2, %v925_v27 }
 0x301   :  { %v929_v5 = vpop.f32.mrb[96].mxu0 }
 0x302   :  { %v930_v6 = vadd.f32 %v1872_v52, %v929_v5  ;;  %v1368_v8 = vpop.f32.mrb[97].mxu0 }
 0x303   :  { %v932_v9 = vpop.f32.mrb[98].mxu0 }
 0x304   :  { %997 = vst.msk [vmem:[%s2071_s7 + $0xe0] sm:$0xff] %vm968_vm2, %v930_v6  ;;  %v933_v10 = vadd.f32 %v1872_v52, %v932_v9  ;;  %v1369_v11 = vpop.f32.mrb[99].mxu0 }
 0x306   :  { %998 = vst.msk [vmem:[%s2071_s7 + $0xe8] sm:$0xff] %vm968_vm2, %v933_v10 }
 0x309   :  { %v937_v12 = vpop.f32.mrb[100].mxu0 }
 0x30a   :  { %v938_v13 = vadd.f32 %v1872_v52, %v937_v12  ;;  %v1372_v14 = vpop.f32.mrb[101].mxu0 }
 0x30b   :  { %v940_v15 = vpop.f32.mrb[102].mxu0 }
 0x30c   :  { %999 = vst.msk [vmem:[%s2071_s7 + $0xf0] sm:$0xff] %vm968_vm2, %v938_v13  ;;  %v941_v16 = vadd.f32 %v1872_v52, %v940_v15  ;;  %v1373_v17 = vpop.f32.mrb[103].mxu0 }
 0x30e   :  { %1000 = vst.msk [vmem:[%s2071_s7 + $0xf8] sm:$0xff] %vm968_vm2, %v941_v16 }
 0x311   :  { %v945_v18 = vpop.f32.mrb[104].mxu0 }
 0x312   :  { %v946_v19 = vadd.f32 %v1872_v52, %v945_v18  ;;  %v1376_v20 = vpop.f32.mrb[105].mxu0 }
 0x313   :  { %v948_v21 = vpop.f32.mrb[106].mxu0 }
 0x314   :  { %1001 = vst.msk [vmem:[%s2071_s7 + $0x100] sm:$0xff] %vm968_vm2, %v946_v19  ;;  %v949_v22 = vadd.f32 %v1872_v52, %v948_v21  ;;  %v1377_v23 = vpop.f32.mrb[107].mxu0 }
 0x316   :  { %1002 = vst.msk [vmem:[%s2071_s7 + $0x108] sm:$0xff] %vm968_vm2, %v949_v22 }
 0x319   :  { %v953_v24 = vpop.f32.mrb[108].mxu0 }
 0x31a   :  { %v954_v25 = vadd.f32 %v1872_v52, %v953_v24  ;;  %v1380_v26 = vpop.f32.mrb[109].mxu0 }
 0x31b   :  { %v956_v28 = vpop.f32.mrb[110].mxu0 }
 0x31c   :  { %1003 = vst.msk [vmem:[%s2071_s7 + $0x110] sm:$0xff] %vm968_vm2, %v954_v25  ;;  %v957_v29 = vadd.f32 %v1872_v52, %v956_v28  ;;  %v1381_v31 = vpop.f32.mrb[111].mxu0 }
 0x31e   :  { %1004 = vst.msk [vmem:[%s2071_s7 + $0x118] sm:$0xff] %vm968_vm2, %v957_v29 }
 0x321   :  { %v961_v32 = vpop.f32.mrb[112].mxu0 }
 0x322   :  { %v962_v33 = vadd.f32 %v1872_v52, %v961_v32  ;;  %v1384_v34 = vpop.f32.mrb[113].mxu0 }
 0x323   :  { %v964_v35 = vpop.f32.mrb[114].mxu0 }
 0x324   :  { %1005 = vst.msk [vmem:[%s2071_s7 + $0x120] sm:$0xff] %vm968_vm2, %v962_v33  ;;  %v965_v36 = vadd.f32 %v1872_v52, %v964_v35  ;;  %v1385_v37 = vpop.f32.mrb[115].mxu0 }
 0x326   :  { %1006 = vst.msk [vmem:[%s2071_s7 + $0x128] sm:$0xff] %vm968_vm2, %v965_v36 }

</bundles_post_ra>
